<compile_context>
chip_gen: v7x
topology: tpu7x:2x2x1
jax: 0.10.0
libtpu: 0.0.40
codegen_flags: <defaults>
</compile_context>

<pallas_src>
import jax
import jax.numpy as jnp
from jax.experimental import pallas as pl
from jax.experimental.pallas import tpu as pltpu


# ----------------------------- Pallas kernels ------------------------------

def _mm_bn_relu_kernel(p_ref, w_ref, scale_ref, shift_ref, o_ref):
    acc = jnp.dot(p_ref[...], w_ref[...], preferred_element_type=jnp.float32)
    y = acc * scale_ref[...] + shift_ref[...]
    o_ref[...] = jnp.maximum(y, 0.0).astype(o_ref.dtype)


def _mm_bn_kernel(p_ref, w_ref, scale_ref, shift_ref, o_ref):
    acc = jnp.dot(p_ref[...], w_ref[...], preferred_element_type=jnp.float32)
    o_ref[...] = (acc * scale_ref[...] + shift_ref[...]).astype(o_ref.dtype)


def _mm_bn_add_relu_kernel(p_ref, w_ref, scale_ref, shift_ref, res_ref, o_ref):
    acc = jnp.dot(p_ref[...], w_ref[...], preferred_element_type=jnp.float32)
    y = acc * scale_ref[...] + shift_ref[...] + res_ref[...].astype(jnp.float32)
    o_ref[...] = jnp.maximum(y, 0.0).astype(o_ref.dtype)


_KERNELS = {
    "bn": _mm_bn_kernel,
    "bn_relu": _mm_bn_relu_kernel,
    "bn_add_relu": _mm_bn_add_relu_kernel,
}


def _matmul_bn_epilogue(patches, w_mat, scale, shift, kind, residual=None,
                        tile_m=512):
    """out = epilogue(patches @ w_mat), tiled over rows with a Pallas kernel."""
    m, k = patches.shape
    k_w, cout = w_mat.shape
    assert k == k_w

    if m <= tile_m:
        tm, m_pad = m, m                    # single full-extent block
    else:
        tm = tile_m                         # large 512-row tiles per grid step
        m_pad = pl.cdiv(m, tm) * tm
        if m_pad != m:
            patches = jnp.pad(patches, ((0, m_pad - m), (0, 0)))
            if residual is not None:
                residual = jnp.pad(residual, ((0, m_pad - m), (0, 0)))
    grid = (m_pad // tm,)

    scale2 = scale.reshape(1, cout).astype(jnp.float32)
    shift2 = shift.reshape(1, cout).astype(jnp.float32)

    in_specs = [
        pl.BlockSpec((tm, k), lambda i: (i, 0)),      # patch tile
        pl.BlockSpec((k, cout), lambda i: (0, 0)),    # weight matrix (resident)
        pl.BlockSpec((1, cout), lambda i: (0, 0)),    # bn scale
        pl.BlockSpec((1, cout), lambda i: (0, 0)),    # bn shift
    ]
    args = [patches, w_mat, scale2, shift2]
    if kind == "bn_add_relu":
        in_specs.append(pl.BlockSpec((tm, cout), lambda i: (i, 0)))
        args.append(residual)

    bytes_accessed = 4 * (m_pad * k + k * cout + 2 * cout + m_pad * cout
                          + (m_pad * cout if kind == "bn_add_relu" else 0))

    out = pl.pallas_call(
        _KERNELS[kind],
        out_shape=jax.ShapeDtypeStruct((m_pad, cout), jnp.float32),
        grid_spec=pltpu.PrefetchScalarGridSpec(
            num_scalar_prefetch=0,
            grid=grid,
            in_specs=in_specs,
            out_specs=pl.BlockSpec((tm, cout), lambda i: (i, 0)),
        ),
        compiler_params=pltpu.CompilerParams(
            dimension_semantics=("parallel",)),
        cost_estimate=pl.CostEstimate(
            flops=2 * m_pad * k * cout,
            transcendentals=0,
            bytes_accessed=bytes_accessed),
    )(*args)
    return out if m_pad == m else out[:m]


# --------------------------- JAX-side plumbing ------------------------------

def _extract_patches_3x3(x_nhwc, stride):
    """im2col for a 3x3 conv with padding=1 (pure slicing / layout only)."""
    n, h, w, c = x_nhwc.shape
    xp = jnp.pad(x_nhwc, ((0, 0), (1, 1), (1, 1), (0, 0)))
    ho = (h + 2 - 3) // stride + 1
    wo = (w + 2 - 3) // stride + 1
    cols = []
    for dh in range(3):
        for dw in range(3):
            cols.append(xp[:, dh:dh + (ho - 1) * stride + 1:stride,
                              dw:dw + (wo - 1) * stride + 1:stride, :])
    patches = jnp.concatenate(cols, axis=-1)            # (n, ho, wo, 9*c)
    return patches.reshape(n * ho * wo, 9 * c), (n, ho, wo)


def _w3x3_to_mat(w):
    """(Cout, Cin, 3, 3) -> (9*Cin, Cout), matching patch ordering (kh,kw,Cin)."""
    return jnp.transpose(w, (2, 3, 1, 0)).reshape(-1, w.shape[0])


def _fold_bn(stats, eps=1e-5):
    gamma, beta, mean, var = stats
    scale = gamma / jnp.sqrt(var + eps)
    shift = beta - mean * scale
    return scale, shift


def basic_block_forward(x, params, stride=1):
    """Pallas forward pass of BasicBlock. x is NCHW float32; returns NCHW."""
    n, cin, h, w = x.shape
    cout = params["w1"].shape[0]
    x_nhwc = jnp.transpose(x, (0, 2, 3, 1)).astype(jnp.float32)

    # conv1 + bn1 + relu
    p1, (_, ho, wo) = _extract_patches_3x3(x_nhwc, stride)
    s1, b1 = _fold_bn(params["bn1"])
    h1 = _matmul_bn_epilogue(p1, _w3x3_to_mat(params["w1"]), s1, b1, "bn_relu")
    h1_nhwc = h1.reshape(n, ho, wo, cout)

    # shortcut (identity, or 1x1 conv + bn when downsampling)
    if stride != 1 or cin != cout:
        xs = x_nhwc[:, ::stride, ::stride, :].reshape(n * ho * wo, cin)
        ss, bs = _fold_bn(params["bns"])
        ws_mat = params["ws"].reshape(cout, cin).T
        shortcut = _matmul_bn_epilogue(xs, ws_mat, ss, bs, "bn")
    else:
        shortcut = x_nhwc.reshape(n * ho * wo, cout)

    # conv2 + bn2 + residual add + relu (fused epilogue)
    p2, _ = _extract_patches_3x3(h1_nhwc, 1)
    s2, b2 = _fold_bn(params["bn2"])
    out = _matmul_bn_epilogue(p2, _w3x3_to_mat(params["w2"]), s2, b2,
                              "bn_add_relu", residual=shortcut)
    return jnp.transpose(out.reshape(n, ho, wo, cout), (0, 3, 1, 2))


# ------------------------------ reference -----------------------------------

def _ref_basic_block(x, params, stride):
    def conv(x, w, s, pad):
        return jax.lax.conv_general_dilated(
            x, w, window_strides=(s, s), padding=[(pad, pad), (pad, pad)],
            dimension_numbers=("NCHW", "OIHW", "NCHW"))

    def bn(x, stats, eps=1e-5):
        gamma, beta, mean, var = stats
        s = gamma / jnp.sqrt(var + eps)
        b = beta - mean * s
        return x * s[None, :, None, None] + b[None, :, None, None]

    out = jax.nn.relu(bn(conv(x, params["w1"], stride, 1), params["bn1"]))
    out = bn(conv(out, params["w2"], 1, 1), params["bn2"])
    if stride != 1 or x.shape[1] != params["w1"].shape[0]:
        sc = bn(conv(x, params["ws"], stride, 0), params["bns"])
    else:
        sc = x
    return jax.nn.relu(out + sc)


def _init_params(key, in_planes, planes, stride):
    ks = jax.random.split(key, 11)

    def bn_params(k, c):
        k0, k1, k2, k3 = jax.random.split(k, 4)
        gamma = 1.0 + 0.1 * jax.random.normal(k0, (c,), jnp.float32)
        beta = 0.1 * jax.random.normal(k1, (c,), jnp.float32)
        mean = 0.1 * jax.random.normal(k2, (c,), jnp.float32)
        var = jax.random.uniform(k3, (c,), jnp.float32, 0.5, 1.5)
        return gamma, beta, mean, var

    p = {
        "w1": 0.2 * jax.random.normal(ks[0], (planes, in_planes, 3, 3), jnp.float32),
        "bn1": bn_params(ks[1], planes),
        "w2": 0.2 * jax.random.normal(ks[2], (planes, planes, 3, 3), jnp.float32),
        "bn2": bn_params(ks[3], planes),
    }
    if stride != 1 or in_planes != planes:
        p["ws"] = 0.2 * jax.random.normal(ks[4], (planes, in_planes, 1, 1), jnp.float32)
        p["bns"] = bn_params(ks[5], planes)
    return p


if __name__ == "__main__":
    key = jax.random.PRNGKey(0)
    k_x, k_p1, k_p2 = jax.random.split(key, 3)

    x = jax.random.normal(k_x, (2, 4, 16, 16), dtype=jnp.float32)

    # Config 1: identity shortcut (in_planes == planes, stride == 1).
    params1 = _init_params(k_p1, in_planes=4, planes=4, stride=1)
    y1 = basic_block_forward(x, params1, stride=1)
    jax.block_until_ready(y1)
    r1 = _ref_basic_block(x, params1, stride=1)
    assert y1.shape == r1.shape == (2, 4, 16, 16)
    assert bool(jnp.allclose(y1, r1, atol=1e-4, rtol=1e-4)), \
        float(jnp.max(jnp.abs(y1 - r1)))

    # Config 2: downsample shortcut (stride=2, planes=8) -> 1x1 conv + bn path.
    params2 = _init_params(k_p2, in_planes=4, planes=8, stride=2)
    y2 = basic_block_forward(x, params2, stride=2)
    jax.block_until_ready(y2)
    r2 = _ref_basic_block(x, params2, stride=2)
    assert y2.shape == r2.shape == (2, 8, 8, 8)
    assert bool(jnp.allclose(y2, r2, atol=1e-4, rtol=1e-4)), \
        float(jnp.max(jnp.abs(y2 - r2)))

    print("KERNEL_OK")
</pallas_src>

<mosaic_0001>
module attributes {stable_mosaic.version = 11 : i64} {
  func.func @_mm_bn_relu_kernel(%arg0: i32, %arg1: memref<512x36xf32, #tpu.memory_space<vmem>>, %arg2: memref<36x4xf32, #tpu.memory_space<vmem>>, %arg3: memref<1x4xf32, #tpu.memory_space<vmem>>, %arg4: memref<1x4xf32, #tpu.memory_space<vmem>>, %arg5: memref<512x4xf32, #tpu.memory_space<vmem>>) attributes {dimension_semantics = [#tpu.dimension_semantics<parallel>], iteration_bounds = array<i64: 1>, scalar_prefetch = 0 : i64, scratch_operands = 0 : i64, tpu.core_type = #tpu.core_type<tc>, window_params = [{transform_indices = @transform_0, window_bounds = array<i64: 512, 36>}, {pipeline_mode = #tpu.pipeline_mode<synchronous>, transform_indices = @transform_1, window_bounds = array<i64: 36, 4>}, {pipeline_mode = #tpu.pipeline_mode<synchronous>, transform_indices = @transform_2, window_bounds = array<i64: 1, 4>}, {pipeline_mode = #tpu.pipeline_mode<synchronous>, transform_indices = @transform_3, window_bounds = array<i64: 1, 4>}, {transform_indices = @transform_4, window_bounds = array<i64: 512, 4>}]} {
    %c0 = arith.constant 0 : index
    %c0_0 = arith.constant 0 : index
    %0 = vector.load %arg1[%c0, %c0_0] : memref<512x36xf32, #tpu.memory_space<vmem>>, vector<512x36xf32>
    %c0_1 = arith.constant 0 : index
    %c0_2 = arith.constant 0 : index
    %1 = vector.load %arg2[%c0_1, %c0_2] : memref<36x4xf32, #tpu.memory_space<vmem>>, vector<36x4xf32>
    %cst = arith.constant dense<0.000000e+00> : vector<512x4xf32>
    %2 = tpu.matmul %0, %1, %cst {dimension_numbers = #tpu.dot_dimension_numbers<[1], [0], [0], [1], [0, 0, 1, 1], [], []>} : vector<512x36xf32>, vector<36x4xf32>, vector<512x4xf32> -> vector<512x4xf32>
    %c0_3 = arith.constant 0 : index
    %c0_4 = arith.constant 0 : index
    %3 = vector.load %arg3[%c0_3, %c0_4] : memref<1x4xf32, #tpu.memory_space<vmem>>, vector<1x4xf32>
    %4 = vector.broadcast %3 : vector<1x4xf32> to vector<512x4xf32>
    %5 = arith.mulf %2, %4 : vector<512x4xf32>
    %c0_5 = arith.constant 0 : index
    %c0_6 = arith.constant 0 : index
    %6 = vector.load %arg4[%c0_5, %c0_6] : memref<1x4xf32, #tpu.memory_space<vmem>>, vector<1x4xf32>
    %7 = vector.broadcast %6 : vector<1x4xf32> to vector<512x4xf32>
    %8 = arith.addf %5, %7 : vector<512x4xf32>
    %cst_7 = arith.constant 0.000000e+00 : f32
    %9 = vector.broadcast %cst_7 : f32 to vector<512x4xf32>
    %10 = arith.maximumf %8, %9 : vector<512x4xf32>
    %c0_8 = arith.constant 0 : index
    %c0_9 = arith.constant 0 : index
    %11 = vector.load %arg5[%c0_8, %c0_9] : memref<512x4xf32, #tpu.memory_space<vmem>>, vector<512x4xf32>
    tpu.vector_store %arg5[%c0_8, %c0_9], %10 {strides = array<i32>} : memref<512x4xf32, #tpu.memory_space<vmem>>, vector<512x4xf32>,
    return
  }
  func.func @transform_0(%arg0: i32) -> (i32, i32) {
    %c0_i32 = arith.constant 0 : i32
    %c0_i32_0 = arith.constant 0 : i32
    return %arg0, %c0_i32 : i32, i32
  }
  func.func @transform_1(%arg0: i32) -> (i32, i32) {
    %c0_i32 = arith.constant 0 : i32
    %c0_i32_0 = arith.constant 0 : i32
    %c0_i32_1 = arith.constant 0 : i32
    return %c0_i32, %c0_i32_0 : i32, i32
  }
  func.func @transform_2(%arg0: i32) -> (i32, i32) {
    %c0_i32 = arith.constant 0 : i32
    %c0_i32_0 = arith.constant 0 : i32
    %c0_i32_1 = arith.constant 0 : i32
    return %c0_i32, %c0_i32_0 : i32, i32
  }
  func.func @transform_3(%arg0: i32) -> (i32, i32) {
    %c0_i32 = arith.constant 0 : i32
    %c0_i32_0 = arith.constant 0 : i32
    %c0_i32_1 = arith.constant 0 : i32
    return %c0_i32, %c0_i32_0 : i32, i32
  }
  func.func @transform_4(%arg0: i32) -> (i32, i32) {
    %c0_i32 = arith.constant 0 : i32
    %c0_i32_0 = arith.constant 0 : i32
    return %arg0, %c0_i32 : i32, i32
  }
}

</mosaic_0001>

<bundles_post_ra>
// kernel: tpu_custom_call.1
= control target key start
LH: loop header
LB: loop body
LE: loop exit
PB: predicated region body
PF: predicated region fallthrough
CT: control target
= control target key end

     0   :  { %vm86_vm0 = vcmask 293888   ;;  %vm279_vm1 = vcmask 1043456   ;;  %vm874_vm2 = vcmask 31744   ;;  %s1889_s1 = inlined_call_operand.vmem [shape: f32[36,4], index: 1, kind: input, shape index: {}]   ;;  %s1890_s0 = inlined_call_operand.vmem [shape: f32[512,36], index: 0, kind: input, shape index: {}]   ;;  %s1891_s2 = inlined_call_operand.vmem [shape: f32[1,4], index: 2, kind: input, shape index: {}]   ;;  %s1892_s3 = inlined_call_operand.vmem [shape: f32[1,4], index: 3, kind: input, shape index: {}]   ;;  %s1893_s4 = inlined_call_operand.vmem [shape: f32[512,4], index: 4, kind: output, shape index: {}]  }
   0x1   :  { %v81_v0 = vld [vmem:[%s1889_s1] sm:$0xff]  ;;  %v82_v1 = vld [vmem:[%s1889_s1 + $0x8] sm:$0xff]  ;;  %v83_v2 = vld [vmem:[%s1889_s1 + $0x10] sm:$0xff] }
   0x2   :  { %v1185_v3 = vpack.c.bf16 %v82_v1, %v81_v0  ;;  %v84_v4 = vld [vmem:[%s1889_s1 + $0x18] sm:$0xff]  ;;  %v17_v5 = vld [vmem:[%s1890_s0] sm:$0xff]  ;;  %v18_v9 = vld [vmem:[%s1890_s0 + $0x8] sm:$0xff] }
   0x3   :  { %v1189_v6 = vpack.c.bf16 %v84_v4, %v83_v2  ;;  %1089 = vmatprep.mubr.msk.f32.mxu0 %vm86_vm0, %v17_v5  ;;  %v49_v7 = vld [vmem:[%s1890_s0 + $0x100] sm:$0xff]  ;;  %v50_v10 = vld [vmem:[%s1890_s0 + $0x108] sm:$0xff]  ;;  %v19_v11 = vld [vmem:[%s1890_s0 + $0x10] sm:$0xff] }
   0x4   :  { %1186 = vmatprep.subr.bf16.mxu0 %v1185_v3  ;;  %1193 = vmatprep.subr.bf16.mxu1 %v1185_v3  ;;  %v85_v8 = vld [vmem:[%s1889_s1 + $0x20] sm:$0xf]  ;;  %v51_v12 = vld [vmem:[%s1890_s0 + $0x110] sm:$0xff]  ;;  %v20_v13 = vld [vmem:[%s1890_s0 + $0x18] sm:$0xff] }
   0x5   :  { %1188 = vmatpush3.bf16.msra.mxu0 %v1185_v3  ;;  %1196 = vmatpush3.bf16.msra.mxu1 %v1185_v3  ;;  %v52_v14 = vld [vmem:[%s1890_s0 + $0x118] sm:$0xff]  ;;  %v21_v15 = vld [vmem:[%s1890_s0 + $0x20] sm:$0xff]  ;;  %v22_v17 = vld [vmem:[%s1890_s0 + $0x28] sm:$0xff] }
   0x6   :  { %1190 = vmatprep.subr.bf16.mxu0 %v1189_v6  ;;  %1194 = vmatprep.subr.bf16.mxu1 %v1189_v6  ;;  %v53_v16 = vld [vmem:[%s1890_s0 + $0x120] sm:$0xff]  ;;  %v54_v18 = vld [vmem:[%s1890_s0 + $0x128] sm:$0xff]  ;;  %v23_v19 = vld [vmem:[%s1890_s0 + $0x30] sm:$0xff] }
   0x7   :  { %1137 = vmatprep.mubr.msk.f32.mxu1 %vm86_vm0, %v49_v7  ;;  %v55_v20 = vld [vmem:[%s1890_s0 + $0x130] sm:$0xff]  ;;  %v24_v21 = vld [vmem:[%s1890_s0 + $0x38] sm:$0xff]  ;;  %v25_v23 = vld [vmem:[%s1890_s0 + $0x40] sm:$0xff] }
   0x8   :  { %v56_v22 = vld [vmem:[%s1890_s0 + $0x138] sm:$0xff]  ;;  %v57_v24 = vld [vmem:[%s1890_s0 + $0x140] sm:$0xff]  ;;  %v26_v25 = vld [vmem:[%s1890_s0 + $0x48] sm:$0xff] }
   0x9   :  { %1192 = vmatpush3.bf16.msra.mxu0 %v1189_v6  ;;  %1197 = vmatpush3.bf16.msra.mxu1 %v1189_v6  ;;  %v58_v26 = vld [vmem:[%s1890_s0 + $0x148] sm:$0xff]  ;;  %v27_v27 = vld [vmem:[%s1890_s0 + $0x50] sm:$0xff]  ;;  %v28_v29 = vld [vmem:[%s1890_s0 + $0x58] sm:$0xff] }
   0xa   :  { %1087 = vmatprep.subr.msk.mxu0 %vm279_vm1, %v85_v8  ;;  %1195 = vmatprep.subr.msk.mxu1 %vm279_vm1, %v85_v8  ;;  %v59_v28 = vld [vmem:[%s1890_s0 + $0x150] sm:$0xff]  ;;  %v60_v30 = vld [vmem:[%s1890_s0 + $0x158] sm:$0xff]  ;;  %v29_v31 = vld [vmem:[%s1890_s0 + $0x60] sm:$0xff] }
   0xb   :  { %v61_v32 = vld [vmem:[%s1890_s0 + $0x160] sm:$0xff]  ;;  %v30_v33 = vld [vmem:[%s1890_s0 + $0x68] sm:$0xff]  ;;  %v31_v35 = vld [vmem:[%s1890_s0 + $0x70] sm:$0xff] }
   0xc   :  { %v62_v34 = vld [vmem:[%s1890_s0 + $0x168] sm:$0xff]  ;;  %v63_v36 = vld [vmem:[%s1890_s0 + $0x170] sm:$0xff]  ;;  %v32_v37 = vld [vmem:[%s1890_s0 + $0x78] sm:$0xff] }
   0xd   :  { %1088 = vmatpush3.msk.msra.mxu0 %vm279_vm1, %v85_v8  ;;  %1198 = vmatpush3.msk.msra.mxu1 %vm279_vm1, %v85_v8  ;;  %v64_v38 = vld [vmem:[%s1890_s0 + $0x178] sm:$0xff]  ;;  %v33_v39 = vld [vmem:[%s1890_s0 + $0x80] sm:$0xff]  ;;  %v34_v41 = vld [vmem:[%s1890_s0 + $0x88] sm:$0xff] }
   0xe   :  { %1090 = vmatmul.mubr.msk.f32.vlgmr.msra.gmra.mrb[0].mxu0 %vm86_vm0, %v18_v9  ;;  %1138 = vmatmul.mubr.msk.f32.vlgmr.msra.gmra.mrb[0].mxu1 %vm86_vm0, %v50_v10  ;;  %v65_v40 = vld [vmem:[%s1890_s0 + $0x180] sm:$0xff]  ;;  %v66_v42 = vld [vmem:[%s1890_s0 + $0x188] sm:$0xff]  ;;  %v35_v43 = vld [vmem:[%s1890_s0 + $0x90] sm:$0xff] }
   0xf   :  { %1092 = vmatprep.mubr.msk.f32.mxu0 %vm86_vm0, %v19_v11  ;;  %1140 = vmatprep.mubr.msk.f32.mxu1 %vm86_vm0, %v51_v12  ;;  %v67_v44 = vld [vmem:[%s1890_s0 + $0x190] sm:$0xff]  ;;  %v36_v45 = vld [vmem:[%s1890_s0 + $0x98] sm:$0xff]  ;;  %v37_v47 = vld [vmem:[%s1890_s0 + $0xa0] sm:$0xff] }
  0x10   :  { %v68_v46 = vld [vmem:[%s1890_s0 + $0x198] sm:$0xff]  ;;  %v69_v48 = vld [vmem:[%s1890_s0 + $0x1a0] sm:$0xff]  ;;  %v38_v49 = vld [vmem:[%s1890_s0 + $0xa8] sm:$0xff] }
  0x11   :  { %v70_v50 = vld [vmem:[%s1890_s0 + $0x1a8] sm:$0xff]  ;;  %v39_v51 = vld [vmem:[%s1890_s0 + $0xb0] sm:$0xff]  ;;  %v40_v53 = vld [vmem:[%s1890_s0 + $0xb8] sm:$0xff] }
  0x12   :  { %1093 = vmatmul.mubr.msk.f32.gmra.mrb[2].mxu0 %vm86_vm0, %v20_v13  ;;  %1141 = vmatmul.mubr.msk.f32.gmra.mrb[2].mxu1 %vm86_vm0, %v52_v14  ;;  %v71_v52 = vld [vmem:[%s1890_s0 + $0x1b0] sm:$0xff]  ;;  %v72_v54 = vld [vmem:[%s1890_s0 + $0x1b8] sm:$0xff]  ;;  %v41_v55 = vld [vmem:[%s1890_s0 + $0xc0] sm:$0xff] }
  0x13   :  { %1095 = vmatprep.mubr.msk.f32.mxu0 %vm86_vm0, %v21_v15  ;;  %1143 = vmatprep.mubr.msk.f32.mxu1 %vm86_vm0, %v53_v16  ;;  %v73_v56 = vld [vmem:[%s1890_s0 + $0x1c0] sm:$0xff]  ;;  %v42_v57 = vld [vmem:[%s1890_s0 + $0xc8] sm:$0xff]  ;;  %v43_v59 = vld [vmem:[%s1890_s0 + $0xd0] sm:$0xff] }
  0x14   :  { %v74_v58 = vld [vmem:[%s1890_s0 + $0x1c8] sm:$0xff]  ;;  %v75_v60 = vld [vmem:[%s1890_s0 + $0x1d0] sm:$0xff]  ;;  %v44_v61 = vld [vmem:[%s1890_s0 + $0xd8] sm:$0xff] }
  0x15   :  { %v76_v62 = vld [vmem:[%s1890_s0 + $0x1d8] sm:$0xff]  ;;  %v45_v63 = vld [vmem:[%s1890_s0 + $0xe0] sm:$0xff]  ;;  %v46_v1 = vld [vmem:[%s1890_s0 + $0xe8] sm:$0xff] }
  0x16   :  { %1096 = vmatmul.mubr.msk.f32.gmra.mrb[4].mxu0 %vm86_vm0, %v22_v17  ;;  %1144 = vmatmul.mubr.msk.f32.gmra.mrb[4].mxu1 %vm86_vm0, %v54_v18  ;;  %v77_v0 = vld [vmem:[%s1890_s0 + $0x1e0] sm:$0xff]  ;;  %v78_v2 = vld [vmem:[%s1890_s0 + $0x1e8] sm:$0xff]  ;;  %v47_v3 = vld [vmem:[%s1890_s0 + $0xf0] sm:$0xff] }
  0x17   :  { %1098 = vmatprep.mubr.msk.f32.mxu0 %vm86_vm0, %v23_v19  ;;  %1146 = vmatprep.mubr.msk.f32.mxu1 %vm86_vm0, %v55_v20  ;;  %v79_v4 = vld [vmem:[%s1890_s0 + $0x1f0] sm:$0xff]  ;;  %v48_v5 = vld [vmem:[%s1890_s0 + $0xf8] sm:$0xff]  ;;  %v1498_v7 = vld [vmem:[%s1891_s2] ss:$0 sm:$0xff] }
  0x18   :  { %v80_v6 = vld [vmem:[%s1890_s0 + $0x1f8] sm:$0xff]  ;;  %v1503_v9 = vld [vmem:[%s1892_s3] ss:$0 sm:$0xff] }
  0x1a   :  { %1099 = vmatmul.mubr.msk.f32.gmra.mrb[6].mxu0 %vm86_vm0, %v24_v21  ;;  %1147 = vmatmul.mubr.msk.f32.gmra.mrb[6].mxu1 %vm86_vm0, %v56_v22 }
  0x1b   :  { %1101 = vmatprep.mubr.msk.f32.mxu0 %vm86_vm0, %v25_v23  ;;  %1149 = vmatprep.mubr.msk.f32.mxu1 %vm86_vm0, %v57_v24 }
  0x1e   :  { %1102 = vmatmul.mubr.msk.f32.gmra.mrb[8].mxu0 %vm86_vm0, %v26_v25  ;;  %1150 = vmatmul.mubr.msk.f32.gmra.mrb[8].mxu1 %vm86_vm0, %v58_v26 }
  0x1f   :  { %1104 = vmatprep.mubr.msk.f32.mxu0 %vm86_vm0, %v27_v27  ;;  %1152 = vmatprep.mubr.msk.f32.mxu1 %vm86_vm0, %v59_v28 }
  0x22   :  { %1105 = vmatmul.mubr.msk.f32.gmra.mrb[10].mxu0 %vm86_vm0, %v28_v29  ;;  %1153 = vmatmul.mubr.msk.f32.gmra.mrb[10].mxu1 %vm86_vm0, %v60_v30 }
  0x23   :  { %1107 = vmatprep.mubr.msk.f32.mxu0 %vm86_vm0, %v29_v31  ;;  %1155 = vmatprep.mubr.msk.f32.mxu1 %vm86_vm0, %v61_v32 }
  0x26   :  { %1108 = vmatmul.mubr.msk.f32.gmra.mrb[12].mxu0 %vm86_vm0, %v30_v33  ;;  %1156 = vmatmul.mubr.msk.f32.gmra.mrb[12].mxu1 %vm86_vm0, %v62_v34 }
  0x27   :  { %1110 = vmatprep.mubr.msk.f32.mxu0 %vm86_vm0, %v31_v35  ;;  %1158 = vmatprep.mubr.msk.f32.mxu1 %vm86_vm0, %v63_v36 }
  0x2a   :  { %1111 = vmatmul.mubr.msk.f32.gmra.mrb[14].mxu0 %vm86_vm0, %v32_v37  ;;  %1159 = vmatmul.mubr.msk.f32.gmra.mrb[14].mxu1 %vm86_vm0, %v64_v38 }
  0x2b   :  { %1113 = vmatprep.mubr.msk.f32.mxu0 %vm86_vm0, %v33_v39  ;;  %1161 = vmatprep.mubr.msk.f32.mxu1 %vm86_vm0, %v65_v40 }
  0x2e   :  { %1114 = vmatmul.mubr.msk.f32.gmra.mrb[16].mxu0 %vm86_vm0, %v34_v41  ;;  %1162 = vmatmul.mubr.msk.f32.gmra.mrb[16].mxu1 %vm86_vm0, %v66_v42 }
  0x2f   :  { %1116 = vmatprep.mubr.msk.f32.mxu0 %vm86_vm0, %v35_v43  ;;  %1164 = vmatprep.mubr.msk.f32.mxu1 %vm86_vm0, %v67_v44 }
  0x32   :  { %1117 = vmatmul.mubr.msk.f32.gmra.mrb[18].mxu0 %vm86_vm0, %v36_v45  ;;  %1165 = vmatmul.mubr.msk.f32.gmra.mrb[18].mxu1 %vm86_vm0, %v68_v46 }
  0x33   :  { %1119 = vmatprep.mubr.msk.f32.mxu0 %vm86_vm0, %v37_v47  ;;  %1167 = vmatprep.mubr.msk.f32.mxu1 %vm86_vm0, %v69_v48 }
  0x36   :  { %1120 = vmatmul.mubr.msk.f32.gmra.mrb[20].mxu0 %vm86_vm0, %v38_v49  ;;  %1168 = vmatmul.mubr.msk.f32.gmra.mrb[20].mxu1 %vm86_vm0, %v70_v50 }
  0x37   :  { %1122 = vmatprep.mubr.msk.f32.mxu0 %vm86_vm0, %v39_v51  ;;  %1170 = vmatprep.mubr.msk.f32.mxu1 %vm86_vm0, %v71_v52 }
  0x3a   :  { %1123 = vmatmul.mubr.msk.f32.gmra.mrb[22].mxu0 %vm86_vm0, %v40_v53  ;;  %1171 = vmatmul.mubr.msk.f32.gmra.mrb[22].mxu1 %vm86_vm0, %v72_v54 }
  0x3b   :  { %1125 = vmatprep.mubr.msk.f32.mxu0 %vm86_vm0, %v41_v55  ;;  %1173 = vmatprep.mubr.msk.f32.mxu1 %vm86_vm0, %v73_v56 }
  0x3e   :  { %1126 = vmatmul.mubr.msk.f32.gmra.mrb[24].mxu0 %vm86_vm0, %v42_v57  ;;  %1174 = vmatmul.mubr.msk.f32.gmra.mrb[24].mxu1 %vm86_vm0, %v74_v58 }
  0x3f   :  { %1128 = vmatprep.mubr.msk.f32.mxu0 %vm86_vm0, %v43_v59  ;;  %1176 = vmatprep.mubr.msk.f32.mxu1 %vm86_vm0, %v75_v60 }
  0x42   :  { %1129 = vmatmul.mubr.msk.f32.gmra.mrb[26].mxu0 %vm86_vm0, %v44_v61  ;;  %1177 = vmatmul.mubr.msk.f32.gmra.mrb[26].mxu1 %vm86_vm0, %v76_v62 }
  0x43   :  { %1131 = vmatprep.mubr.msk.f32.mxu0 %vm86_vm0, %v45_v63  ;;  %1179 = vmatprep.mubr.msk.f32.mxu1 %vm86_vm0, %v77_v0 }
  0x46   :  { %1132 = vmatmul.mubr.msk.f32.gmra.mrb[28].mxu0 %vm86_vm0, %v46_v1  ;;  %1180 = vmatmul.mubr.msk.f32.gmra.mrb[28].mxu1 %vm86_vm0, %v78_v2 }
  0x47   :  { %1134 = vmatprep.mubr.msk.f32.mxu0 %vm86_vm0, %v47_v3  ;;  %1182 = vmatprep.mubr.msk.f32.mxu1 %vm86_vm0, %v79_v4 }
  0x4a   :  { %1135 = vmatmul.mubr.msk.f32.gmra.mrb[30].mxu0 %vm86_vm0, %v48_v5  ;;  %1183 = vmatmul.mubr.msk.f32.gmra.mrb[30].mxu1 %vm86_vm0, %v80_v6 }
  0xe1   :  { %v1091_v8 = vpop.f32.mrb[0].mxu0  ;;  %v1139_v10 = vpop.f32.mrb[0].mxu1 }
  0xe2   :  { %v676_v11 = vmul.f32 %v1091_v8, %v1498_v7  ;;  %v708_v12 = vmul.f32 %v1139_v10, %v1498_v7  ;;  %v349_v13 = vpop.f32.mrb[1].mxu0  ;;  %v509_v14 = vpop.f32.mrb[1].mxu1 }
  0xe3   :  { %v675_v15 = vmul.f32 %v1498_v7, %v349_v13  ;;  %v707_v16 = vmul.f32 %v1498_v7, %v509_v14 }
  0xe4   :  { %v747_v17 = vadd.f32 %v1503_v9, %v676_v11  ;;  %v779_v18 = vadd.f32 %v1503_v9, %v708_v12 }
  0xe5   :  { %v746_v19 = vadd.f32 %v1503_v9, %v675_v15  ;;  %v778_v20 = vadd.f32 %v1503_v9, %v707_v16  ;;  %v1094_v21 = vpop.f32.mrb[2].mxu0  ;;  %v1142_v22 = vpop.f32.mrb[2].mxu1 }
  0xe6   :  { %v811_v23 = vmax.f32 %v747_v17, 0.0  ;;  %v843_v24 = vmax.f32 %v779_v18, 0.0  ;;  %v678_v25 = vmul.f32 %v1094_v21, %v1498_v7  ;;  %v710_v26 = vmul.f32 %v1142_v22, %v1498_v7  ;;  %v359_v27 = vpop.f32.mrb[3].mxu0  ;;  %v519_v28 = vpop.f32.mrb[3].mxu1 }
  0xe7   :  { %v810_v29 = vmax.f32 %v746_v19, 0.0  ;;  %v842_v30 = vmax.f32 %v778_v20, 0.0  ;;  %v677_v31 = vmul.f32 %v1498_v7, %v359_v27  ;;  %v709_v32 = vmul.f32 %v1498_v7, %v519_v28 }
  0xe8   :  { %876 = vst.msk [vmem:[%s1893_s4 + $0x8] sm:$0xff] %vm874_vm2, %v811_v23  ;;  %908 = vst.msk [vmem:[%s1893_s4 + $0x108] sm:$0xff] %vm874_vm2, %v843_v24  ;;  %v749_v33 = vadd.f32 %v1503_v9, %v678_v25  ;;  %v781_v34 = vadd.f32 %v1503_v9, %v710_v26 }
  0xe9   :  { %875 = vst.msk [vmem:[%s1893_s4] sm:$0xff] %vm874_vm2, %v810_v29  ;;  %907 = vst.msk [vmem:[%s1893_s4 + $0x100] sm:$0xff] %vm874_vm2, %v842_v30  ;;  %v748_v35 = vadd.f32 %v1503_v9, %v677_v31  ;;  %v780_v36 = vadd.f32 %v1503_v9, %v709_v32  ;;  %v1097_v37 = vpop.f32.mrb[4].mxu0  ;;  %v1145_v38 = vpop.f32.mrb[4].mxu1 }
  0xea   :  { %v813_v39 = vmax.f32 %v749_v33, 0.0  ;;  %v845_v40 = vmax.f32 %v781_v34, 0.0  ;;  %v680_v41 = vmul.f32 %v1097_v37, %v1498_v7  ;;  %v712_v42 = vmul.f32 %v1145_v38, %v1498_v7  ;;  %v369_v43 = vpop.f32.mrb[5].mxu0  ;;  %v529_v44 = vpop.f32.mrb[5].mxu1 }
  0xeb   :  { %v812_v45 = vmax.f32 %v748_v35, 0.0  ;;  %v844_v46 = vmax.f32 %v780_v36, 0.0  ;;  %v679_v47 = vmul.f32 %v1498_v7, %v369_v43  ;;  %v711_v48 = vmul.f32 %v1498_v7, %v529_v44 }
  0xec   :  { %878 = vst.msk [vmem:[%s1893_s4 + $0x18] sm:$0xff] %vm874_vm2, %v813_v39  ;;  %910 = vst.msk [vmem:[%s1893_s4 + $0x118] sm:$0xff] %vm874_vm2, %v845_v40  ;;  %v751_v49 = vadd.f32 %v1503_v9, %v680_v41  ;;  %v783_v50 = vadd.f32 %v1503_v9, %v712_v42 }
  0xed   :  { %877 = vst.msk [vmem:[%s1893_s4 + $0x10] sm:$0xff] %vm874_vm2, %v812_v45  ;;  %909 = vst.msk [vmem:[%s1893_s4 + $0x110] sm:$0xff] %vm874_vm2, %v844_v46  ;;  %v750_v51 = vadd.f32 %v1503_v9, %v679_v47  ;;  %v782_v52 = vadd.f32 %v1503_v9, %v711_v48  ;;  %v1100_v53 = vpop.f32.mrb[6].mxu0  ;;  %v1148_v54 = vpop.f32.mrb[6].mxu1 }
  0xee   :  { %v815_v55 = vmax.f32 %v751_v49, 0.0  ;;  %v847_v56 = vmax.f32 %v783_v50, 0.0  ;;  %v682_v57 = vmul.f32 %v1100_v53, %v1498_v7  ;;  %v714_v58 = vmul.f32 %v1148_v54, %v1498_v7  ;;  %v379_v59 = vpop.f32.mrb[7].mxu0  ;;  %v539_v60 = vpop.f32.mrb[7].mxu1 }
  0xef   :  { %v814_v61 = vmax.f32 %v750_v51, 0.0  ;;  %v846_v62 = vmax.f32 %v782_v52, 0.0  ;;  %v681_v63 = vmul.f32 %v1498_v7, %v379_v59  ;;  %v713_v0 = vmul.f32 %v1498_v7, %v539_v60 }
  0xf0   :  { %880 = vst.msk [vmem:[%s1893_s4 + $0x28] sm:$0xff] %vm874_vm2, %v815_v55  ;;  %912 = vst.msk [vmem:[%s1893_s4 + $0x128] sm:$0xff] %vm874_vm2, %v847_v56  ;;  %v753_v1 = vadd.f32 %v1503_v9, %v682_v57  ;;  %v785_v2 = vadd.f32 %v1503_v9, %v714_v58 }
  0xf1   :  { %879 = vst.msk [vmem:[%s1893_s4 + $0x20] sm:$0xff] %vm874_vm2, %v814_v61  ;;  %911 = vst.msk [vmem:[%s1893_s4 + $0x120] sm:$0xff] %vm874_vm2, %v846_v62  ;;  %v752_v3 = vadd.f32 %v1503_v9, %v681_v63  ;;  %v784_v4 = vadd.f32 %v1503_v9, %v713_v0  ;;  %v1103_v5 = vpop.f32.mrb[8].mxu0  ;;  %v1151_v6 = vpop.f32.mrb[8].mxu1 }
  0xf2   :  { %v817_v8 = vmax.f32 %v753_v1, 0.0  ;;  %v849_v10 = vmax.f32 %v785_v2, 0.0  ;;  %v684_v11 = vmul.f32 %v1103_v5, %v1498_v7  ;;  %v716_v12 = vmul.f32 %v1151_v6, %v1498_v7  ;;  %v389_v13 = vpop.f32.mrb[9].mxu0  ;;  %v549_v14 = vpop.f32.mrb[9].mxu1 }
  0xf3   :  { %v816_v15 = vmax.f32 %v752_v3, 0.0  ;;  %v848_v16 = vmax.f32 %v784_v4, 0.0  ;;  %v683_v17 = vmul.f32 %v1498_v7, %v389_v13  ;;  %v715_v18 = vmul.f32 %v1498_v7, %v549_v14 }
  0xf4   :  { %882 = vst.msk [vmem:[%s1893_s4 + $0x38] sm:$0xff] %vm874_vm2, %v817_v8  ;;  %914 = vst.msk [vmem:[%s1893_s4 + $0x138] sm:$0xff] %vm874_vm2, %v849_v10  ;;  %v755_v19 = vadd.f32 %v1503_v9, %v684_v11  ;;  %v787_v20 = vadd.f32 %v1503_v9, %v716_v12 }
  0xf5   :  { %881 = vst.msk [vmem:[%s1893_s4 + $0x30] sm:$0xff] %vm874_vm2, %v816_v15  ;;  %913 = vst.msk [vmem:[%s1893_s4 + $0x130] sm:$0xff] %vm874_vm2, %v848_v16  ;;  %v754_v21 = vadd.f32 %v1503_v9, %v683_v17  ;;  %v786_v22 = vadd.f32 %v1503_v9, %v715_v18  ;;  %v1106_v23 = vpop.f32.mrb[10].mxu0  ;;  %v1154_v24 = vpop.f32.mrb[10].mxu1 }
  0xf6   :  { %v819_v25 = vmax.f32 %v755_v19, 0.0  ;;  %v851_v26 = vmax.f32 %v787_v20, 0.0  ;;  %v686_v27 = vmul.f32 %v1106_v23, %v1498_v7  ;;  %v718_v28 = vmul.f32 %v1154_v24, %v1498_v7  ;;  %v399_v29 = vpop.f32.mrb[11].mxu0  ;;  %v559_v30 = vpop.f32.mrb[11].mxu1 }
  0xf7   :  { %v818_v31 = vmax.f32 %v754_v21, 0.0  ;;  %v850_v32 = vmax.f32 %v786_v22, 0.0  ;;  %v685_v33 = vmul.f32 %v1498_v7, %v399_v29  ;;  %v717_v34 = vmul.f32 %v1498_v7, %v559_v30 }
  0xf8   :  { %884 = vst.msk [vmem:[%s1893_s4 + $0x48] sm:$0xff] %vm874_vm2, %v819_v25  ;;  %916 = vst.msk [vmem:[%s1893_s4 + $0x148] sm:$0xff] %vm874_vm2, %v851_v26  ;;  %v757_v35 = vadd.f32 %v1503_v9, %v686_v27  ;;  %v789_v36 = vadd.f32 %v1503_v9, %v718_v28 }
  0xf9   :  { %883 = vst.msk [vmem:[%s1893_s4 + $0x40] sm:$0xff] %vm874_vm2, %v818_v31  ;;  %915 = vst.msk [vmem:[%s1893_s4 + $0x140] sm:$0xff] %vm874_vm2, %v850_v32  ;;  %v756_v37 = vadd.f32 %v1503_v9, %v685_v33  ;;  %v788_v38 = vadd.f32 %v1503_v9, %v717_v34  ;;  %v1109_v39 = vpop.f32.mrb[12].mxu0  ;;  %v1157_v40 = vpop.f32.mrb[12].mxu1 }
  0xfa   :  { %v821_v41 = vmax.f32 %v757_v35, 0.0  ;;  %v853_v42 = vmax.f32 %v789_v36, 0.0  ;;  %v688_v43 = vmul.f32 %v1109_v39, %v1498_v7  ;;  %v720_v44 = vmul.f32 %v1157_v40, %v1498_v7  ;;  %v409_v45 = vpop.f32.mrb[13].mxu0  ;;  %v569_v46 = vpop.f32.mrb[13].mxu1 }
  0xfb   :  { %v820_v47 = vmax.f32 %v756_v37, 0.0  ;;  %v852_v48 = vmax.f32 %v788_v38, 0.0  ;;  %v687_v49 = vmul.f32 %v1498_v7, %v409_v45  ;;  %v719_v50 = vmul.f32 %v1498_v7, %v569_v46 }
  0xfc   :  { %886 = vst.msk [vmem:[%s1893_s4 + $0x58] sm:$0xff] %vm874_vm2, %v821_v41  ;;  %918 = vst.msk [vmem:[%s1893_s4 + $0x158] sm:$0xff] %vm874_vm2, %v853_v42  ;;  %v759_v51 = vadd.f32 %v1503_v9, %v688_v43  ;;  %v791_v52 = vadd.f32 %v1503_v9, %v720_v44 }
  0xfd   :  { %885 = vst.msk [vmem:[%s1893_s4 + $0x50] sm:$0xff] %vm874_vm2, %v820_v47  ;;  %917 = vst.msk [vmem:[%s1893_s4 + $0x150] sm:$0xff] %vm874_vm2, %v852_v48  ;;  %v758_v53 = vadd.f32 %v1503_v9, %v687_v49  ;;  %v790_v54 = vadd.f32 %v1503_v9, %v719_v50  ;;  %v1112_v55 = vpop.f32.mrb[14].mxu0  ;;  %v1160_v56 = vpop.f32.mrb[14].mxu1 }
  0xfe   :  { %v823_v57 = vmax.f32 %v759_v51, 0.0  ;;  %v855_v58 = vmax.f32 %v791_v52, 0.0  ;;  %v690_v59 = vmul.f32 %v1112_v55, %v1498_v7  ;;  %v722_v60 = vmul.f32 %v1160_v56, %v1498_v7  ;;  %v419_v61 = vpop.f32.mrb[15].mxu0  ;;  %v579_v62 = vpop.f32.mrb[15].mxu1 }
  0xff   :  { %v822_v63 = vmax.f32 %v758_v53, 0.0  ;;  %v854_v0 = vmax.f32 %v790_v54, 0.0  ;;  %v689_v1 = vmul.f32 %v1498_v7, %v419_v61  ;;  %v721_v2 = vmul.f32 %v1498_v7, %v579_v62 }
 0x100   :  { %888 = vst.msk [vmem:[%s1893_s4 + $0x68] sm:$0xff] %vm874_vm2, %v823_v57  ;;  %920 = vst.msk [vmem:[%s1893_s4 + $0x168] sm:$0xff] %vm874_vm2, %v855_v58  ;;  %v761_v3 = vadd.f32 %v1503_v9, %v690_v59  ;;  %v793_v4 = vadd.f32 %v1503_v9, %v722_v60 }
 0x101   :  { %887 = vst.msk [vmem:[%s1893_s4 + $0x60] sm:$0xff] %vm874_vm2, %v822_v63  ;;  %919 = vst.msk [vmem:[%s1893_s4 + $0x160] sm:$0xff] %vm874_vm2, %v854_v0  ;;  %v760_v5 = vadd.f32 %v1503_v9, %v689_v1  ;;  %v792_v6 = vadd.f32 %v1503_v9, %v721_v2  ;;  %v1115_v8 = vpop.f32.mrb[16].mxu0  ;;  %v1163_v10 = vpop.f32.mrb[16].mxu1 }
 0x102   :  { %v825_v11 = vmax.f32 %v761_v3, 0.0  ;;  %v857_v12 = vmax.f32 %v793_v4, 0.0  ;;  %v692_v13 = vmul.f32 %v1115_v8, %v1498_v7  ;;  %v724_v14 = vmul.f32 %v1163_v10, %v1498_v7  ;;  %v429_v15 = vpop.f32.mrb[17].mxu0  ;;  %v589_v16 = vpop.f32.mrb[17].mxu1 }
 0x103   :  { %v824_v17 = vmax.f32 %v760_v5, 0.0  ;;  %v856_v18 = vmax.f32 %v792_v6, 0.0  ;;  %v691_v19 = vmul.f32 %v1498_v7, %v429_v15  ;;  %v723_v20 = vmul.f32 %v1498_v7, %v589_v16 }
 0x104   :  { %890 = vst.msk [vmem:[%s1893_s4 + $0x78] sm:$0xff] %vm874_vm2, %v825_v11  ;;  %922 = vst.msk [vmem:[%s1893_s4 + $0x178] sm:$0xff] %vm874_vm2, %v857_v12  ;;  %v763_v21 = vadd.f32 %v1503_v9, %v692_v13  ;;  %v795_v22 = vadd.f32 %v1503_v9, %v724_v14 }
 0x105   :  { %889 = vst.msk [vmem:[%s1893_s4 + $0x70] sm:$0xff] %vm874_vm2, %v824_v17  ;;  %921 = vst.msk [vmem:[%s1893_s4 + $0x170] sm:$0xff] %vm874_vm2, %v856_v18  ;;  %v762_v23 = vadd.f32 %v1503_v9, %v691_v19  ;;  %v794_v24 = vadd.f32 %v1503_v9, %v723_v20  ;;  %v1118_v25 = vpop.f32.mrb[18].mxu0  ;;  %v1166_v26 = vpop.f32.mrb[18].mxu1 }
 0x106   :  { %v827_v27 = vmax.f32 %v763_v21, 0.0  ;;  %v859_v28 = vmax.f32 %v795_v22, 0.0  ;;  %v694_v29 = vmul.f32 %v1118_v25, %v1498_v7  ;;  %v726_v30 = vmul.f32 %v1166_v26, %v1498_v7  ;;  %v439_v31 = vpop.f32.mrb[19].mxu0  ;;  %v599_v32 = vpop.f32.mrb[19].mxu1 }
 0x107   :  { %v826_v33 = vmax.f32 %v762_v23, 0.0  ;;  %v858_v34 = vmax.f32 %v794_v24, 0.0  ;;  %v693_v35 = vmul.f32 %v1498_v7, %v439_v31  ;;  %v725_v36 = vmul.f32 %v1498_v7, %v599_v32 }
 0x108   :  { %892 = vst.msk [vmem:[%s1893_s4 + $0x88] sm:$0xff] %vm874_vm2, %v827_v27  ;;  %924 = vst.msk [vmem:[%s1893_s4 + $0x188] sm:$0xff] %vm874_vm2, %v859_v28  ;;  %v765_v37 = vadd.f32 %v1503_v9, %v694_v29  ;;  %v797_v38 = vadd.f32 %v1503_v9, %v726_v30 }
 0x109   :  { %891 = vst.msk [vmem:[%s1893_s4 + $0x80] sm:$0xff] %vm874_vm2, %v826_v33  ;;  %923 = vst.msk [vmem:[%s1893_s4 + $0x180] sm:$0xff] %vm874_vm2, %v858_v34  ;;  %v764_v39 = vadd.f32 %v1503_v9, %v693_v35  ;;  %v796_v40 = vadd.f32 %v1503_v9, %v725_v36  ;;  %v1121_v41 = vpop.f32.mrb[20].mxu0  ;;  %v1169_v42 = vpop.f32.mrb[20].mxu1 }
 0x10a   :  { %v829_v43 = vmax.f32 %v765_v37, 0.0  ;;  %v861_v44 = vmax.f32 %v797_v38, 0.0  ;;  %v696_v45 = vmul.f32 %v1121_v41, %v1498_v7  ;;  %v728_v46 = vmul.f32 %v1169_v42, %v1498_v7  ;;  %v449_v47 = vpop.f32.mrb[21].mxu0  ;;  %v609_v48 = vpop.f32.mrb[21].mxu1 }
 0x10b   :  { %v828_v49 = vmax.f32 %v764_v39, 0.0  ;;  %v860_v50 = vmax.f32 %v796_v40, 0.0  ;;  %v695_v51 = vmul.f32 %v1498_v7, %v449_v47  ;;  %v727_v52 = vmul.f32 %v1498_v7, %v609_v48 }
 0x10c   :  { %894 = vst.msk [vmem:[%s1893_s4 + $0x98] sm:$0xff] %vm874_vm2, %v829_v43  ;;  %926 = vst.msk [vmem:[%s1893_s4 + $0x198] sm:$0xff] %vm874_vm2, %v861_v44  ;;  %v767_v53 = vadd.f32 %v1503_v9, %v696_v45  ;;  %v799_v54 = vadd.f32 %v1503_v9, %v728_v46 }
 0x10d   :  { %893 = vst.msk [vmem:[%s1893_s4 + $0x90] sm:$0xff] %vm874_vm2, %v828_v49  ;;  %925 = vst.msk [vmem:[%s1893_s4 + $0x190] sm:$0xff] %vm874_vm2, %v860_v50  ;;  %v766_v55 = vadd.f32 %v1503_v9, %v695_v51  ;;  %v798_v56 = vadd.f32 %v1503_v9, %v727_v52  ;;  %v1124_v57 = vpop.f32.mrb[22].mxu0  ;;  %v1172_v58 = vpop.f32.mrb[22].mxu1 }
 0x10e   :  { %v831_v59 = vmax.f32 %v767_v53, 0.0  ;;  %v863_v60 = vmax.f32 %v799_v54, 0.0  ;;  %v698_v61 = vmul.f32 %v1124_v57, %v1498_v7  ;;  %v730_v62 = vmul.f32 %v1172_v58, %v1498_v7  ;;  %v459_v63 = vpop.f32.mrb[23].mxu0  ;;  %v619_v0 = vpop.f32.mrb[23].mxu1 }
 0x10f   :  { %v830_v1 = vmax.f32 %v766_v55, 0.0  ;;  %v862_v2 = vmax.f32 %v798_v56, 0.0  ;;  %v697_v3 = vmul.f32 %v1498_v7, %v459_v63  ;;  %v729_v4 = vmul.f32 %v1498_v7, %v619_v0 }
 0x110   :  { %896 = vst.msk [vmem:[%s1893_s4 + $0xa8] sm:$0xff] %vm874_vm2, %v831_v59  ;;  %928 = vst.msk [vmem:[%s1893_s4 + $0x1a8] sm:$0xff] %vm874_vm2, %v863_v60  ;;  %v769_v5 = vadd.f32 %v1503_v9, %v698_v61  ;;  %v801_v6 = vadd.f32 %v1503_v9, %v730_v62 }
 0x111   :  { %895 = vst.msk [vmem:[%s1893_s4 + $0xa0] sm:$0xff] %vm874_vm2, %v830_v1  ;;  %927 = vst.msk [vmem:[%s1893_s4 + $0x1a0] sm:$0xff] %vm874_vm2, %v862_v2  ;;  %v768_v8 = vadd.f32 %v1503_v9, %v697_v3  ;;  %v800_v10 = vadd.f32 %v1503_v9, %v729_v4  ;;  %v1127_v11 = vpop.f32.mrb[24].mxu0  ;;  %v1175_v12 = vpop.f32.mrb[24].mxu1 }
 0x112   :  { %v833_v13 = vmax.f32 %v769_v5, 0.0  ;;  %v865_v14 = vmax.f32 %v801_v6, 0.0  ;;  %v700_v15 = vmul.f32 %v1127_v11, %v1498_v7  ;;  %v732_v16 = vmul.f32 %v1175_v12, %v1498_v7  ;;  %v469_v17 = vpop.f32.mrb[25].mxu0  ;;  %v629_v18 = vpop.f32.mrb[25].mxu1 }
 0x113   :  { %v832_v19 = vmax.f32 %v768_v8, 0.0  ;;  %v864_v20 = vmax.f32 %v800_v10, 0.0  ;;  %v699_v21 = vmul.f32 %v1498_v7, %v469_v17  ;;  %v731_v22 = vmul.f32 %v1498_v7, %v629_v18 }
 0x114   :  { %898 = vst.msk [vmem:[%s1893_s4 + $0xb8] sm:$0xff] %vm874_vm2, %v833_v13  ;;  %930 = vst.msk [vmem:[%s1893_s4 + $0x1b8] sm:$0xff] %vm874_vm2, %v865_v14  ;;  %v771_v23 = vadd.f32 %v1503_v9, %v700_v15  ;;  %v803_v24 = vadd.f32 %v1503_v9, %v732_v16 }
 0x115   :  { %897 = vst.msk [vmem:[%s1893_s4 + $0xb0] sm:$0xff] %vm874_vm2, %v832_v19  ;;  %929 = vst.msk [vmem:[%s1893_s4 + $0x1b0] sm:$0xff] %vm874_vm2, %v864_v20  ;;  %v770_v25 = vadd.f32 %v1503_v9, %v699_v21  ;;  %v802_v26 = vadd.f32 %v1503_v9, %v731_v22  ;;  %v1130_v27 = vpop.f32.mrb[26].mxu0  ;;  %v1178_v28 = vpop.f32.mrb[26].mxu1 }
 0x116   :  { %v835_v29 = vmax.f32 %v771_v23, 0.0  ;;  %v867_v30 = vmax.f32 %v803_v24, 0.0  ;;  %v702_v31 = vmul.f32 %v1130_v27, %v1498_v7  ;;  %v734_v32 = vmul.f32 %v1178_v28, %v1498_v7  ;;  %v479_v33 = vpop.f32.mrb[27].mxu0  ;;  %v639_v34 = vpop.f32.mrb[27].mxu1 }
 0x117   :  { %v834_v35 = vmax.f32 %v770_v25, 0.0  ;;  %v866_v36 = vmax.f32 %v802_v26, 0.0  ;;  %v701_v37 = vmul.f32 %v1498_v7, %v479_v33  ;;  %v733_v38 = vmul.f32 %v1498_v7, %v639_v34 }
 0x118   :  { %900 = vst.msk [vmem:[%s1893_s4 + $0xc8] sm:$0xff] %vm874_vm2, %v835_v29  ;;  %932 = vst.msk [vmem:[%s1893_s4 + $0x1c8] sm:$0xff] %vm874_vm2, %v867_v30  ;;  %v773_v39 = vadd.f32 %v1503_v9, %v702_v31  ;;  %v805_v40 = vadd.f32 %v1503_v9, %v734_v32 }
 0x119   :  { %899 = vst.msk [vmem:[%s1893_s4 + $0xc0] sm:$0xff] %vm874_vm2, %v834_v35  ;;  %931 = vst.msk [vmem:[%s1893_s4 + $0x1c0] sm:$0xff] %vm874_vm2, %v866_v36  ;;  %v772_v41 = vadd.f32 %v1503_v9, %v701_v37  ;;  %v804_v42 = vadd.f32 %v1503_v9, %v733_v38  ;;  %v1133_v43 = vpop.f32.mrb[28].mxu0  ;;  %v1181_v44 = vpop.f32.mrb[28].mxu1 }
 0x11a   :  { %v837_v45 = vmax.f32 %v773_v39, 0.0  ;;  %v869_v46 = vmax.f32 %v805_v40, 0.0  ;;  %v704_v47 = vmul.f32 %v1133_v43, %v1498_v7  ;;  %v736_v48 = vmul.f32 %v1181_v44, %v1498_v7  ;;  %v489_v49 = vpop.f32.mrb[29].mxu0  ;;  %v649_v50 = vpop.f32.mrb[29].mxu1 }
 0x11b   :  { %v836_v51 = vmax.f32 %v772_v41, 0.0  ;;  %v868_v52 = vmax.f32 %v804_v42, 0.0  ;;  %v703_v53 = vmul.f32 %v1498_v7, %v489_v49  ;;  %v735_v54 = vmul.f32 %v1498_v7, %v649_v50 }
 0x11c   :  { %902 = vst.msk [vmem:[%s1893_s4 + $0xd8] sm:$0xff] %vm874_vm2, %v837_v45  ;;  %934 = vst.msk [vmem:[%s1893_s4 + $0x1d8] sm:$0xff] %vm874_vm2, %v869_v46  ;;  %v775_v55 = vadd.f32 %v1503_v9, %v704_v47  ;;  %v807_v56 = vadd.f32 %v1503_v9, %v736_v48 }
 0x11d   :  { %901 = vst.msk [vmem:[%s1893_s4 + $0xd0] sm:$0xff] %vm874_vm2, %v836_v51  ;;  %933 = vst.msk [vmem:[%s1893_s4 + $0x1d0] sm:$0xff] %vm874_vm2, %v868_v52  ;;  %v774_v57 = vadd.f32 %v1503_v9, %v703_v53  ;;  %v806_v58 = vadd.f32 %v1503_v9, %v735_v54  ;;  %v1136_v59 = vpop.f32.mrb[30].mxu0  ;;  %v1184_v60 = vpop.f32.mrb[30].mxu1 }
 0x11e   :  { %v839_v61 = vmax.f32 %v775_v55, 0.0  ;;  %v871_v62 = vmax.f32 %v807_v56, 0.0  ;;  %v706_v63 = vmul.f32 %v1136_v59, %v1498_v7  ;;  %v738_v0 = vmul.f32 %v1184_v60, %v1498_v7  ;;  %v499_v1 = vpop.f32.mrb[31].mxu0  ;;  %v659_v2 = vpop.f32.mrb[31].mxu1 }
 0x11f   :  { %v838_v3 = vmax.f32 %v774_v57, 0.0  ;;  %v870_v4 = vmax.f32 %v806_v58, 0.0  ;;  %v705_v5 = vmul.f32 %v1498_v7, %v499_v1  ;;  %v737_v6 = vmul.f32 %v1498_v7, %v659_v2 }
 0x120   :  { %904 = vst.msk [vmem:[%s1893_s4 + $0xe8] sm:$0xff] %vm874_vm2, %v839_v61  ;;  %936 = vst.msk [vmem:[%s1893_s4 + $0x1e8] sm:$0xff] %vm874_vm2, %v871_v62  ;;  %v777_v8 = vadd.f32 %v1503_v9, %v706_v63  ;;  %v809_v10 = vadd.f32 %v1503_v9, %v738_v0 }
 0x121   :  { %903 = vst.msk [vmem:[%s1893_s4 + $0xe0] sm:$0xff] %vm874_vm2, %v838_v3  ;;  %935 = vst.msk [vmem:[%s1893_s4 + $0x1e0] sm:$0xff] %vm874_vm2, %v870_v4  ;;  %v776_v7 = vadd.f32 %v1503_v9, %v705_v5  ;;  %v808_v11 = vadd.f32 %v1503_v9, %v737_v6 }
 0x122   :  { %v841_v12 = vmax.f32 %v777_v8, 0.0  ;;  %v873_v13 = vmax.f32 %v809_v10, 0.0 }
 0x123   :  { %v840_v14 = vmax.f32 %v776_v7, 0.0  ;;  %v872_v15 = vmax.f32 %v808_v11, 0.0 }
 0x124   :  { %906 = vst.msk [vmem:[%s1893_s4 + $0xf8] sm:$0xff] %vm874_vm2, %v841_v12  ;;  %938 = vst.msk [vmem:[%s1893_s4 + $0x1f8] sm:$0xff] %vm874_vm2, %v873_v13 }
 0x125   :  { %905 = vst.msk [vmem:[%s1893_s4 + $0xf0] sm:$0xff] %vm874_vm2, %v840_v14  ;;  %937 = vst.msk [vmem:[%s1893_s4 + $0x1f0] sm:$0xff] %vm874_vm2, %v872_v15 }

</bundles_post_ra>
